<compile_context>
chip_gen: v7x
topology: tpu7x:2x2x1
jax: 0.10.0
libtpu: 0.0.40
codegen_flags: <defaults>
</compile_context>

<pallas_src>
import functools

import jax
import jax.numpy as jnp
from jax.experimental import pallas as pl
from jax.experimental.pallas import tpu as pltpu


def _round_up(x, m):
    return ((x + m - 1) // m) * m


def _cdiv(a, b):
    return -(-a // b)


def _qfunc_kernel(state_ref, action_ref,
                  w1t_ref, b1_ref,
                  w2h_t_ref, w2a_t_ref, b2_ref,
                  w3_row_ref, b3_ref,
                  out_ref):
    """Fused MLP Q-function forward for one batch tile (weights pre-transposed)."""
    state = state_ref[...]          # (tb, obs_dim)
    action = action_ref[...]        # (tb, act_dim)

    # fc1 + relu  (weights already transposed: (obs_dim, h0))
    h1 = jnp.dot(state, w1t_ref[...], preferred_element_type=jnp.float32)
    h1 = jnp.maximum(h1 + b1_ref[...], 0.0)

    # fc2 on concat([h1, action]):
    #   hidden half on the MXU, action half (K = act_dim, tiny) as a few
    #   VPU broadcast-FMAs instead of a nearly-empty MXU matmul.
    z2 = jnp.dot(h1, w2h_t_ref[...], preferred_element_type=jnp.float32)
    z2 = z2 + b2_ref[...]
    act_dim = action_ref.shape[-1]
    for j in range(act_dim):                      # static unroll, act_dim small
        z2 = z2 + action[:, j:j + 1] * w2a_t_ref[j:j + 1, :]
    h2 = jnp.maximum(z2, 0.0)

    # fc3 (output width 1): VPU multiply + lane reduction; result is laid out
    # lane-dense as a (1, 1, tb) row so the store is an unmasked full vst.
    q = jnp.sum(h2 * w3_row_ref[...], axis=-1) + b3_ref[0]   # (tb,)
    out_ref[...] = q.reshape(out_ref.shape).astype(out_ref.dtype)


def prepare_params(params):
    """One-time layout plumbing: pre-transpose / pre-split weights, 2D biases."""
    w1, b1 = params["w1"], params["b1"]
    w2, b2 = params["w2"], params["b2"]
    w3, b3 = params["w3"], params["b3"]
    h0 = w1.shape[0]
    h1 = w2.shape[0]
    return {
        "w1t": jnp.asarray(w1.T, jnp.float32),                  # (obs_dim, h0)
        "b1": jnp.asarray(b1, jnp.float32).reshape(1, h0),      # (1, h0)
        "w2h_t": jnp.asarray(w2[:, :h0].T, jnp.float32),        # (h0, h1)
        "w2a_t": jnp.asarray(w2[:, h0:].T, jnp.float32),        # (act_dim, h1)
        "b2": jnp.asarray(b2, jnp.float32).reshape(1, h1),      # (1, h1)
        "w3_row": jnp.asarray(w3, jnp.float32).reshape(1, h1),  # (1, h1)
        "b3": jnp.asarray(b3, jnp.float32).reshape(1),          # (1,) scalar (SMEM)
    }


@functools.partial(jax.jit, static_argnames=("block_b",))
def mlp_q_function(state, action, prepared, *, block_b=4096):
    """Fused Pallas Q-function forward, tiled over the batch dimension."""
    B, obs_dim = state.shape
    act_dim = action.shape[1]
    h0 = prepared["w1t"].shape[1]
    h1d = prepared["w2h_t"].shape[1]

    state = state.astype(jnp.float32)
    action = action.astype(jnp.float32)

    # Sublane alignment only: pad at most 7 rows (never a full pad-to-tile copy).
    Bp = _round_up(B, 8)
    if Bp != B:
        state = jnp.pad(state, ((0, Bp - B), (0, 0)))
        action = jnp.pad(action, ((0, Bp - B), (0, 0)))

    # Tile selection: as large as block_b allows (this kernel is grid-step /
    # DMA-overhead bound), but keep >=2 grid steps when the batch is big
    # enough so the "parallel" axis can shard across both v7x TensorCores.
    if Bp <= 16:
        tb = Bp
    else:
        tb = min(_round_up(block_b, 8), _round_up(_cdiv(Bp, 2), 8))
    num_tiles = _cdiv(Bp, tb)          # boundary block (if any) handled by Pallas

    batched = lambda cols: pl.BlockSpec((tb, cols), lambda i: (i, 0))
    resident = lambda r, c: pl.BlockSpec((r, c), lambda i: (0, 0))

    out = pl.pallas_call(
        _qfunc_kernel,
        out_shape=jax.ShapeDtypeStruct((num_tiles, 1, tb), jnp.float32),
        grid=(num_tiles,),
        in_specs=[
            batched(obs_dim),                                   # state
            batched(act_dim),                                   # action
            resident(obs_dim, h0),                              # w1t
            resident(1, h0),                                    # b1
            resident(h0, h1d),                                  # w2h_t
            resident(act_dim, h1d),                             # w2a_t
            resident(1, h1d),                                   # b2
            resident(1, h1d),                                   # w3_row
            pl.BlockSpec(memory_space=pltpu.MemorySpace.SMEM),  # b3 scalar
        ],
        out_specs=pl.BlockSpec((1, 1, tb), lambda i: (i, 0, 0)),
        compiler_params=pltpu.CompilerParams(
            dimension_semantics=("parallel",)),
    )(state, action,
      prepared["w1t"], prepared["b1"],
      prepared["w2h_t"], prepared["w2a_t"], prepared["b2"],
      prepared["w3_row"], prepared["b3"])

    # torch.squeeze(q_val, -1); drop rows past the real batch.
    return out.reshape(-1)[:B]


def init_params(key, obs_dim, act_dim, hidden_sizes):
    """Deterministic init mirroring MLPQFunction._init_weights."""
    h0, h1 = hidden_sizes
    k1, k2, k3 = jax.random.split(key, 3)
    w1_bound = 1.0 / jnp.sqrt(jnp.float32(obs_dim))
    w2_bound = 1.0 / jnp.sqrt(jnp.float32(h0 + act_dim))
    w3_bound = 0.003
    return {
        "w1": jax.random.uniform(k1, (h0, obs_dim), jnp.float32,
                                 minval=-w1_bound, maxval=w1_bound),
        "b1": jnp.zeros((h0,), jnp.float32),
        "w2": jax.random.uniform(k2, (h1, h0 + act_dim), jnp.float32,
                                 minval=-w2_bound, maxval=w2_bound),
        "b2": jnp.zeros((h1,), jnp.float32),
        "w3": jax.random.uniform(k3, (1, h1), jnp.float32,
                                 minval=-w3_bound, maxval=w3_bound),
        "b3": jnp.zeros((1,), jnp.float32),
    }


def _reference(state, action, params):
    h1 = jnp.maximum(state @ params["w1"].T + params["b1"], 0.0)
    h2 = jnp.maximum(jnp.concatenate([h1, action], axis=-1) @ params["w2"].T
                     + params["b2"], 0.0)
    return (h2 @ params["w3"].T + params["b3"])[:, 0]


if __name__ == "__main__":
    obs_dim = 16
    act_dim = 4
    hidden_sizes = (32, 32)

    key = jax.random.PRNGKey(0)
    kp, ks, ka, ks2, ka2, ks3, ka3 = jax.random.split(key, 7)

    params = init_params(kp, obs_dim, act_dim, hidden_sizes)
    prepared = prepare_params(params)

    def check(state, action):
        q = jax.block_until_ready(mlp_q_function(state, action, prepared))
        q_ref = _reference(state, action, params)
        assert q.shape == (state.shape[0],), q.shape
        assert jnp.allclose(q, q_ref, atol=1e-5, rtol=1e-5), (q, q_ref)

    # Case 1: small batch (single grid step, no padding).
    check(jax.random.normal(ks, (8, obs_dim), jnp.float32),
          jax.random.normal(ka, (8, act_dim), jnp.float32))

    # Case 2: batch not divisible by the tile (2 grid steps, partial boundary block).
    check(jax.random.normal(ks2, (200, obs_dim), jnp.float32),
          jax.random.normal(ka2, (200, act_dim), jnp.float32))

    # Case 3: batch not a multiple of 8 (exercises the <=7-row alignment pad).
    check(jax.random.normal(ks3, (13, obs_dim), jnp.float32),
          jax.random.normal(ka3, (13, act_dim), jnp.float32))

    print("KERNEL_OK")
</pallas_src>

<mosaic_0001>
module attributes {stable_mosaic.version = 11 : i64} {
  func.func @_qfunc_kernel(%arg0: i32, %arg1: memref<8x16xf32, #tpu.memory_space<vmem>>, %arg2: memref<8x4xf32, #tpu.memory_space<vmem>>, %arg3: memref<16x32xf32, #tpu.memory_space<vmem>>, %arg4: memref<1x32xf32, #tpu.memory_space<vmem>>, %arg5: memref<32x32xf32, #tpu.memory_space<vmem>>, %arg6: memref<4x32xf32, #tpu.memory_space<vmem>>, %arg7: memref<1x32xf32, #tpu.memory_space<vmem>>, %arg8: memref<1x32xf32, #tpu.memory_space<vmem>>, %arg9: memref<1xf32, #tpu.memory_space<smem>>, %arg10: memref<1x1x8xf32, #tpu.memory_space<vmem>>) attributes {dimension_semantics = [#tpu.dimension_semantics<parallel>], iteration_bounds = array<i64: 1>, scalar_prefetch = 0 : i64, scratch_operands = 0 : i64, tpu.core_type = #tpu.core_type<tc>, window_params = [{transform_indices = @transform_0, window_bounds = array<i64: 8, 16>}, {transform_indices = @transform_1, window_bounds = array<i64: 8, 4>}, {pipeline_mode = #tpu.pipeline_mode<synchronous>, transform_indices = @transform_2, window_bounds = array<i64: 16, 32>}, {pipeline_mode = #tpu.pipeline_mode<synchronous>, transform_indices = @transform_3, window_bounds = array<i64: 1, 32>}, {pipeline_mode = #tpu.pipeline_mode<synchronous>, transform_indices = @transform_4, window_bounds = array<i64: 32, 32>}, {pipeline_mode = #tpu.pipeline_mode<synchronous>, transform_indices = @transform_5, window_bounds = array<i64: 4, 32>}, {pipeline_mode = #tpu.pipeline_mode<synchronous>, transform_indices = @transform_6, window_bounds = array<i64: 1, 32>}, {pipeline_mode = #tpu.pipeline_mode<synchronous>, transform_indices = @transform_7, window_bounds = array<i64: 1, 32>}, {transform_indices = @transform_8, window_bounds = array<i64: 1>}, {transform_indices = @transform_9, window_bounds = array<i64: 1, 1, 8>}]} {
    %c0 = arith.constant 0 : index
    %c0_0 = arith.constant 0 : index
    %0 = vector.load %arg1[%c0, %c0_0] : memref<8x16xf32, #tpu.memory_space<vmem>>, vector<8x16xf32>
    %c0_1 = arith.constant 0 : index
    %c0_2 = arith.constant 0 : index
    %1 = vector.load %arg2[%c0_1, %c0_2] : memref<8x4xf32, #tpu.memory_space<vmem>>, vector<8x4xf32>
    %c0_3 = arith.constant 0 : index
    %c0_4 = arith.constant 0 : index
    %2 = vector.load %arg3[%c0_3, %c0_4] : memref<16x32xf32, #tpu.memory_space<vmem>>, vector<16x32xf32>
    %cst = arith.constant dense<0.000000e+00> : vector<8x32xf32>
    %3 = tpu.matmul %0, %2, %cst {dimension_numbers = #tpu.dot_dimension_numbers<[1], [0], [0], [1], [0, 0, 1, 1], [], []>} : vector<8x16xf32>, vector<16x32xf32>, vector<8x32xf32> -> vector<8x32xf32>
    %c0_5 = arith.constant 0 : index
    %c0_6 = arith.constant 0 : index
    %4 = vector.load %arg4[%c0_5, %c0_6] : memref<1x32xf32, #tpu.memory_space<vmem>>, vector<1x32xf32>
    %5 = vector.broadcast %4 : vector<1x32xf32> to vector<8x32xf32>
    %6 = arith.addf %3, %5 : vector<8x32xf32>
    %cst_7 = arith.constant 0.000000e+00 : f32
    %7 = vector.broadcast %cst_7 : f32 to vector<8x32xf32>
    %8 = arith.maximumf %6, %7 : vector<8x32xf32>
    %c0_8 = arith.constant 0 : index
    %c0_9 = arith.constant 0 : index
    %9 = vector.load %arg5[%c0_8, %c0_9] : memref<32x32xf32, #tpu.memory_space<vmem>>, vector<32x32xf32>
    %cst_10 = arith.constant dense<0.000000e+00> : vector<8x32xf32>
    %10 = tpu.matmul %8, %9, %cst_10 {dimension_numbers = #tpu.dot_dimension_numbers<[1], [0], [0], [1], [0, 0, 1, 1], [], []>} : vector<8x32xf32>, vector<32x32xf32>, vector<8x32xf32> -> vector<8x32xf32>
    %c0_11 = arith.constant 0 : index
    %c0_12 = arith.constant 0 : index
    %11 = vector.load %arg7[%c0_11, %c0_12] : memref<1x32xf32, #tpu.memory_space<vmem>>, vector<1x32xf32>
    %12 = vector.broadcast %11 : vector<1x32xf32> to vector<8x32xf32>
    %13 = arith.addf %10, %12 : vector<8x32xf32>
    %14 = vector.extract_strided_slice %1 {offsets = [0, 0], sizes = [8, 1], strides = [1, 1]} : vector<8x4xf32> to vector<8x1xf32>
    %c0_13 = arith.constant 0 : index
    %c0_14 = arith.constant 0 : index
    %15 = vector.load %arg6[%c0_13, %c0_14] : memref<4x32xf32, #tpu.memory_space<vmem>>, vector<1x32xf32>
    %16 = vector.broadcast %14 : vector<8x1xf32> to vector<8x32xf32>
    %17 = vector.broadcast %15 : vector<1x32xf32> to vector<8x32xf32>
    %18 = arith.mulf %16, %17 : vector<8x32xf32>
    %19 = arith.addf %13, %18 : vector<8x32xf32>
    %20 = vector.extract_strided_slice %1 {offsets = [0, 1], sizes = [8, 1], strides = [1, 1]} : vector<8x4xf32> to vector<8x1xf32>
    %c1 = arith.constant 1 : index
    %c0_15 = arith.constant 0 : index
    %21 = vector.load %arg6[%c1, %c0_15] : memref<4x32xf32, #tpu.memory_space<vmem>>, vector<1x32xf32>
    %22 = vector.broadcast %20 : vector<8x1xf32> to vector<8x32xf32>
    %23 = vector.broadcast %21 : vector<1x32xf32> to vector<8x32xf32>
    %24 = arith.mulf %22, %23 : vector<8x32xf32>
    %25 = arith.addf %19, %24 : vector<8x32xf32>
    %26 = vector.extract_strided_slice %1 {offsets = [0, 2], sizes = [8, 1], strides = [1, 1]} : vector<8x4xf32> to vector<8x1xf32>
    %c2 = arith.constant 2 : index
    %c0_16 = arith.constant 0 : index
    %27 = vector.load %arg6[%c2, %c0_16] : memref<4x32xf32, #tpu.memory_space<vmem>>, vector<1x32xf32>
    %28 = vector.broadcast %26 : vector<8x1xf32> to vector<8x32xf32>
    %29 = vector.broadcast %27 : vector<1x32xf32> to vector<8x32xf32>
    %30 = arith.mulf %28, %29 : vector<8x32xf32>
    %31 = arith.addf %25, %30 : vector<8x32xf32>
    %32 = vector.extract_strided_slice %1 {offsets = [0, 3], sizes = [8, 1], strides = [1, 1]} : vector<8x4xf32> to vector<8x1xf32>
    %c3 = arith.constant 3 : index
    %c0_17 = arith.constant 0 : index
    %33 = vector.load %arg6[%c3, %c0_17] : memref<4x32xf32, #tpu.memory_space<vmem>>, vector<1x32xf32>
    %34 = vector.broadcast %32 : vector<8x1xf32> to vector<8x32xf32>
    %35 = vector.broadcast %33 : vector<1x32xf32> to vector<8x32xf32>
    %36 = arith.mulf %34, %35 : vector<8x32xf32>
    %37 = arith.addf %31, %36 : vector<8x32xf32>
    %cst_18 = arith.constant 0.000000e+00 : f32
    %38 = vector.broadcast %cst_18 : f32 to vector<8x32xf32>
    %39 = arith.maximumf %37, %38 : vector<8x32xf32>
    %c0_19 = arith.constant 0 : index
    %c0_20 = arith.constant 0 : index
    %40 = vector.load %arg8[%c0_19, %c0_20] : memref<1x32xf32, #tpu.memory_space<vmem>>, vector<1x32xf32>
    %41 = vector.broadcast %40 : vector<1x32xf32> to vector<8x32xf32>
    %42 = arith.mulf %39, %41 : vector<8x32xf32>
    %cst_21 = arith.constant dense<0.000000e+00> : vector<8xf32>
    %43 = vector.multi_reduction <add>, %42, %cst_21 [1] : vector<8x32xf32> to vector<8xf32>
    %c0_22 = arith.constant 0 : index
    %44 = memref.load %arg9[%c0_22] : memref<1xf32, #tpu.memory_space<smem>>
    %45 = vector.broadcast %44 : f32 to vector<8xf32>
    %46 = arith.addf %43, %45 : vector<8xf32>
    %47 = vector.shape_cast %46 : vector<8xf32> to vector<1x1x8xf32>
    %c0_23 = arith.constant 0 : index
    %c0_24 = arith.constant 0 : index
    %c0_25 = arith.constant 0 : index
    %48 = vector.load %arg10[%c0_23, %c0_24, %c0_25] : memref<1x1x8xf32, #tpu.memory_space<vmem>>, vector<1x1x8xf32>
    tpu.vector_store %arg10[%c0_23, %c0_24, %c0_25], %47 {strides = array<i32>} : memref<1x1x8xf32, #tpu.memory_space<vmem>>, vector<1x1x8xf32>,
    return
  }
  func.func @transform_0(%arg0: i32) -> (i32, i32) {
    %c0_i32 = arith.constant 0 : i32
    %c0_i32_0 = arith.constant 0 : i32
    return %arg0, %c0_i32 : i32, i32
  }
  func.func @transform_1(%arg0: i32) -> (i32, i32) {
    %c0_i32 = arith.constant 0 : i32
    %c0_i32_0 = arith.constant 0 : i32
    return %arg0, %c0_i32 : i32, i32
  }
  func.func @transform_2(%arg0: i32) -> (i32, i32) {
    %c0_i32 = arith.constant 0 : i32
    %c0_i32_0 = arith.constant 0 : i32
    %c0_i32_1 = arith.constant 0 : i32
    return %c0_i32, %c0_i32_0 : i32, i32
  }
  func.func @transform_3(%arg0: i32) -> (i32, i32) {
    %c0_i32 = arith.constant 0 : i32
    %c0_i32_0 = arith.constant 0 : i32
    %c0_i32_1 = arith.constant 0 : i32
    return %c0_i32, %c0_i32_0 : i32, i32
  }
  func.func @transform_4(%arg0: i32) -> (i32, i32) {
    %c0_i32 = arith.constant 0 : i32
    %c0_i32_0 = arith.constant 0 : i32
    %c0_i32_1 = arith.constant 0 : i32
    return %c0_i32, %c0_i32_0 : i32, i32
  }
  func.func @transform_5(%arg0: i32) -> (i32, i32) {
    %c0_i32 = arith.constant 0 : i32
    %c0_i32_0 = arith.constant 0 : i32
    %c0_i32_1 = arith.constant 0 : i32
    return %c0_i32, %c0_i32_0 : i32, i32
  }
  func.func @transform_6(%arg0: i32) -> (i32, i32) {
    %c0_i32 = arith.constant 0 : i32
    %c0_i32_0 = arith.constant 0 : i32
    %c0_i32_1 = arith.constant 0 : i32
    return %c0_i32, %c0_i32_0 : i32, i32
  }
  func.func @transform_7(%arg0: i32) -> (i32, i32) {
    %c0_i32 = arith.constant 0 : i32
    %c0_i32_0 = arith.constant 0 : i32
    %c0_i32_1 = arith.constant 0 : i32
    return %c0_i32, %c0_i32_0 : i32, i32
  }
  func.func @transform_8(%arg0: i32) -> i32 {
    %c0_i32 = arith.constant 0 : i32
    %c0_i32_0 = arith.constant 0 : i32
    return %c0_i32 : i32
  }
  func.func @transform_9(%arg0: i32) -> (i32, i32, i32) {
    %c0_i32 = arith.constant 0 : i32
    %c0_i32_0 = arith.constant 0 : i32
    %c0_i32_1 = arith.constant 0 : i32
    return %arg0, %c0_i32, %c0_i32_0 : i32, i32, i32
  }
}

</mosaic_0001>

<bundles_post_ra>
// kernel: mlp_q_function.1
= control target key start
LH: loop header
LB: loop body
LE: loop exit
PB: predicated region body
PF: predicated region fallthrough
CT: control target
= control target key end

     0   :  { %15 = vsyncpa [#allocation4], 0  ;;  %s596_s0 = inlined_call_operand.hbm [shape: f32[8,16], index: 0, kind: input, shape index: {}]   ;;  %s597_s1 = inlined_call_operand.vmem [shape: f32[8,4], index: 1, kind: input, shape index: {}]   ;;  %s598_s2 = inlined_call_operand.hbm [shape: f32[16,32], index: 2, kind: input, shape index: {}]   ;;  %s599_s3 = inlined_call_operand.vmem [shape: f32[1,32], index: 3, kind: input, shape index: {}]   ;;  %s600_s4 = inlined_call_operand.vmem [shape: f32[32,32], index: 4, kind: input, shape index: {}]   ;;  %s601_s5 = inlined_call_operand.vmem [shape: f32[4,32], index: 5, kind: input, shape index: {}]   ;;  %s602_s6 = inlined_call_operand.vmem [shape: f32[1,32], index: 6, kind: input, shape index: {}]   ;;  %s603_s7 = inlined_call_operand.vmem [shape: f32[1,32], index: 7, kind: input, shape index: {}]   ;;  %s604_s8 = inlined_call_operand.<no memory space> [shape: f32[1], index: 8, kind: input, shape index: {}]   ;;  %s605_s9 = inlined_call_operand.hbm [shape: f32[1,1,8], index: 9, kind: output, shape index: {}]  }
   0x1   :  { %16 = vsyncpa [#allocation7], 0 }
   0x2   :  { %17 = vsyncpa [#allocation5], 0  ;;  %s450_s30 = smov [#allocation3]   ;;  %s451_s11 = smov [#allocation6]  }
   0x3   :  { %s24_s10 = sshll.u32 %s450_s30, 4  ;;  %s35_s12 = sshll.u32 %s451_s11, 4  ;;  %s25_s10 = int_to_ptr.vmem [resolvable:$true] %s24_s10  ;;  %s512_s12 = int_to_ptr.vmem [resolvable:$true] %s35_s12 }
   0x4   :  { %s378_s15 = scalar_lea.hbm %s596_s0, 128 }
   0x5   :  { %p379_p0 = scmp.ne.s32.totalorder %s596_s0, %s378_s15  ;;  %p382_p1 = scmp.lt.u32.totalorder %s378_s15, %s596_s0 }
   0x7   :  { %p384_p2 = pnand %p382_p1, %p379_p0 }
   0x9   :  { %387 = shalt.err (!%p384_p2)
}
   0xa   :  { %s388_s20 = scalar_lea.vmem %s25_s10, 128  ;;  %p393_p4 = scmp.lt.s32.totalorder %s25_s10, %s25_s10 }
   0xb   :  { %p389_p3 = scmp.ne.s32.totalorder %s25_s10, %s388_s20  ;;  %p394_p5 = scmp.lt.s32.totalorder %s388_s20, %s388_s20 }
   0xd   :  { %p395_p6 = por %p394_p5, %p393_p4 }
   0xf   :  { %p396_p7 = pnand %p395_p6, %p389_p3 }
  0x11   :  { %399 = shalt.err (!%p396_p7)
}
  0x12   :  { %27 = dma.hbm_to_vmem [thread:$0]  %s596_s0, 128, %s25_s10, [#allocation4]  }
  0x13   :  { %s400_s25 = scalar_lea.hbm %s598_s2, 256 }
  0x14   :  { %p401_p8 = scmp.ne.s32.totalorder %s598_s2, %s400_s25  ;;  %p404_p9 = scmp.lt.u32.totalorder %s400_s25, %s598_s2 }
  0x16   :  { %p406_p10 = pnand %p404_p9, %p401_p8 }
  0x18   :  { %409 = shalt.err (!%p406_p10)
}
  0x19   :  { %s410_s30 = scalar_lea.vmem %s512_s12, 256  ;;  %p415_p12 = scmp.lt.s32.totalorder %s512_s12, %s512_s12 }
  0x1a   :  { %p411_p11 = scmp.ne.s32.totalorder %s512_s12, %s410_s30  ;;  %p416_p13 = scmp.lt.s32.totalorder %s410_s30, %s410_s30 }
  0x1c   :  { %p417_p0 = por %p416_p13, %p415_p12 }
  0x1e   :  { %p418_p1 = pnand %p417_p0, %p411_p11 }
  0x20   :  { %421 = shalt.err (!%p418_p1)
}
  0x21   :  { %s452_s0 = smov 128   ;;  %s453_s10 = smov 8  }
  0x22   :  { %41 = dma.hbm_to_vmem [thread:$0]  %s598_s2, 256, %s512_s12, [#allocation7], %s452_s0, %s452_s0, %s453_s10  }
  0x23   :  { %444 = dma.done.wait [#allocation4], 128  }
  0x24   :  { %445 = vsyncadd [#allocation4], 4294967168 }
  0x25   :  { %446 = dma.done.wait [#allocation7], 256  }
  0x26   :  { %447 = vsyncadd [#allocation7], 4294967040  ;;  %v454_v0 = vmov 0.0|0.0   ;;  %vm455_vm0 = vmmov 0   ;;  %v456_v1 = vmov 0.0   ;;  %v62_v2 = vld [vmem:[#allocation6] sm:$0xff]  ;;  %v292_v46 = vlaneseq }
  0x27   :  { %352 = vmatprep.subr.bf16.mxu0 %v454_v0  ;;  %338 = vmatprep.mubr.msk.f32.mxu0 %vm455_vm0, %v456_v1  ;;  %v63_v3 = vld [vmem:[#allocation6 + $0x8] sm:$0xff]  ;;  %v146_v5 = vld [vmem:[%s600_s4] sm:$0xff]  ;;  %v147_v6 = vld [vmem:[%s600_s4 + $0x8] sm:$0xff]  ;;  %vm71_vm1 = vcmask 130048   ;;  %v457_v13 = vmov 0   ;;  %v458_v14 = vmov 2   ;;  %v289_v49 = vstv %s604_s8 }
  0x28   :  { %355 = vmatprep.subr.bf16.mxu1 %v454_v0  ;;  %349 = vmatprep.mubr.msk.f32.mxu1 %vm455_vm0, %v456_v1  ;;  %v353_v4 = vpack.c.bf16 %v63_v3, %v62_v2  ;;  %v356_v7 = vpack.c.bf16 %v147_v6, %v146_v5  ;;  %v60_v8 = vld [vmem:[#allocation3] sm:$0xff]  ;;  %v148_v9 = vld [vmem:[%s600_s4 + $0x10] sm:$0xff]  ;;  %v149_v10 = vld [vmem:[%s600_s4 + $0x18] sm:$0xff]  ;;  %v459_v15 = vmov 1   ;;  %v460_v16 = vmov 3   ;;  %s461_s11 = smov [#allocation8]  }
  0x29   :  { %v359_v11 = vpack.c.bf16 %v149_v10, %v148_v9  ;;  %v61_v12 = vld [vmem:[%s597_s1] sm:$0xff]  ;;  %373 = vset.pattern.permute.xlu0 %v457_v13  ;;  %375 = vset.pattern.permute.xlu1 %v458_v14  ;;  %vm157_vm2 = vcmask 261120   ;;  %v293_v47 = vand.u32 127, %v292_v46  ;;  %v295_v48 = vshrl.u32 %v292_v46, 7  ;;  %s307_s13 = sshll.u32 %s461_s11, 4  ;;  %s308_s13 = int_to_ptr.vmem [resolvable:$true] %s307_s13 }
  0x2a   :  { %354 = vmatpush3.bf16.msra.mxu0 %v353_v4  ;;  %357 = vmatpush3.bf16.msra.mxu1 %v356_v7  ;;  %v317_v17 = vld [vmem:[%s599_s3] ss:$0 sm:$0xff]  ;;  %v322_v26 = vld [vmem:[%s601_s5 + $0x1] ss:$0 sm:$0xff]  ;;  %v323_v33 = vld [vmem:[%s601_s5 + $0x2] ss:$0 sm:$0xff]  ;;  %p427_p3 = scmp.lt.s32.totalorder %s308_s13, %s308_s13 }
  0x2b   :  { %358 = vmatprep.subr.bf16.mxu1 %v454_v0  ;;  %234 = vperm.xlu0 %373, %v61_v12   ;;  %v321_v24 = vld [vmem:[%s601_s5] ss:$0 sm:$0xff]  ;;  %v324_v34 = vld [vmem:[%s601_s5 + $0x3] ss:$0 sm:$0xff]  ;;  %v296_v50 = vsub.s32 %v293_v47, %v295_v48  ;;  %vm299_vm3 = vcmask 57344   ;;  %s426_s14 = scalar_lea.vmem %s308_s13, 32 }
  0x2c   :  { %256 = vperm.xlu1 %375, %v61_v12   ;;  %v319_v25 = vld [vmem:[%s602_s6] ss:$0 sm:$0xff] }
  0x2d   :  { %339 = vmatmul.mubr.msk.f32.vlgmr.msra.gmra.mrb[0].mxu0 %vm71_vm1, %v60_v8  ;;  %v325_v42 = vld [vmem:[%s603_s7] ss:$0 sm:$0xff]  ;;  %s422_s7 = scalar_lea.vmem %s308_s13, 16 }
  0x2e   :  { %360 = vmatpush3.bf16.msra.mxu1 %v359_v11  ;;  %p423_p2 = scmp.ne.s32.totalorder %s308_s13, %s422_s7  ;;  %p428_p4 = scmp.lt.s32.totalorder %s426_s14, %s422_s7 }
  0x2f   :  { %374 = vset.pattern.permute.xlu0 %v459_v15 }
  0x30   :  { %376 = vset.pattern.permute.xlu1 %v460_v16  ;;  %245 = vperm.xlu0 %374, %v61_v12   ;;  %p429_p5 = por %p428_p4, %p427_p3 }
  0x31   :  { %267 = vperm.xlu1 %376, %v61_v12  }
  0x32   :  { %p430_p6 = pnand %p429_p5, %p423_p2 }
  0x34   :  { %377 = vset.pattern.permute.xlu0 %v460_v16 }
  0xaa   :  { %v235_v22 = vpop.permute.xlu0 %234 }
  0xab   :  { %v257_v23 = vpop.permute.xlu1 %256  ;;  %v241_v29 = vmul.f32 %v321_v24, %v235_v22 }
  0xac   :  { %v263_v37 = vmul.f32 %v323_v33, %v257_v23 }
  0xaf   :  { %v246_v27 = vpop.permute.xlu0 %245 }
  0xb0   :  { %v252_v32 = vmul.f32 %v322_v26, %v246_v27  ;;  %v268_v35 = vpop.permute.xlu1 %267 }
  0xb1   :  { %v274_v39 = vmul.f32 %v324_v34, %v268_v35 }
 0x100   :  { %v141_v18 = vpop.f32.mrb[0].mxu0 }
 0x101   :  { %v142_v19 = vadd.f32 %v317_v17, %v141_v18  ;;  %v340_v20 = vpop.f32.mrb[1].mxu0 }
 0x103   :  { %v145_v21 = vmax.f32 %v142_v19, 0.0 }
 0x105   :  { %350 = vmatmul.mubr.msk.f32.vlgmr.msra.gmra.mrb[0].mxu1 %vm157_vm2, %v145_v21 }
 0x1d8   :  { %v227_v28 = vpop.f32.mrb[0].mxu1 }
 0x1d9   :  { %v228_v30 = vadd.f32 %v319_v25, %v227_v28  ;;  %v351_v31 = vpop.f32.mrb[1].mxu1 }
 0x1db   :  { %v242_v36 = vadd.f32 %v241_v29, %v228_v30 }
 0x1dd   :  { %v253_v38 = vadd.f32 %v252_v32, %v242_v36 }
 0x1df   :  { %v264_v40 = vadd.f32 %v263_v37, %v253_v38 }
 0x1e1   :  { %v275_v41 = vadd.f32 %v274_v39, %v264_v40 }
 0x1e3   :  { %v276_v43 = vmax.f32 %v275_v41, 0.0 }
 0x1e5   :  { %v284_v44 = vmul.f32 %v325_v42, %v276_v43 }
 0x1e7   :  { %v285_v45 = vsel %vm157_vm2, %v284_v44, 0.0 }
 0x1e8   :  { %286 = vadd.xlane.f32.xlu1 %v285_v45 }
 0x275   :  { %v287_v51 = vpop.xlane.xlu1 %286 }
 0x276   :  { %v290_v52 = vadd.f32 %v289_v49, %v287_v51 }
 0x278   :  { %v297_v53 = vrot.slane %v290_v52, %v296_v50 }
 0x27a   :  { %300 = vst.msk [vmem:[#allocation8] sm:$0x1] %vm299_vm3, %v297_v53 }
 0x27b   :  { %433 = shalt.err (!%p430_p6)
}
 0x27c   :  { %s434_s8 = scalar_lea.hbm %s605_s9, 16 }
 0x27d   :  { %p435_p7 = scmp.ne.s32.totalorder %s605_s9, %s434_s8  ;;  %p438_p8 = scmp.lt.u32.totalorder %s434_s8, %s605_s9 }
 0x27f   :  { %p440_p9 = pnand %p438_p8, %p435_p7 }
 0x281   :  { %443 = shalt.err (!%p440_p9)
}
 0x282   :  { %310 = dma.vmem_to_hbm [thread:$0]  %s308_s13, 16, %s605_s9, [#allocation5]  }
 0x283   :  { %448 = dma.done.wait [#allocation5], 16  }
 0x284   :  { %449 = vsyncadd [#allocation5], 4294967280 }
 0x285   :  { %314 = vsyncpa [#allocation4], 1 }
 0x286   :  { %315 = vsyncpa [#allocation7], 1 }
 0x287   :  { %316 = vsyncpa [#allocation5], 1 }

</bundles_post_ra>
